<compile_context>
chip_gen: v5e
topology: v5e:2x2
jax: 0.10.0
libtpu: 0.0.40
codegen_flags: <defaults>
</compile_context>

<pallas_src>
import functools

import jax
import jax.numpy as jnp
from jax.experimental import pallas as pl
from jax.experimental.pallas import tpu as pltpu

_VMEM_WORKING_BUDGET = 40 * 1024 * 1024  # v7x-safe working-set target (64 MiB/TC)


def _round_up(n: int, m: int) -> int:
    return ((n + m - 1) // m) * m


def _usad_kernel(x_ref, we_ref, be_ref, w1_ref, b1_ref, w2_ref, b2_ref,
                 x1_ref, x2_ref):
    cdt = we_ref.dtype                      # streaming/compute dtype (f32 or bf16)
    x = x_ref[...].astype(cdt)

    # encoder: Linear + ReLU (f32 MXU accumulation, f32 bias/ReLU)
    z = jnp.dot(x, we_ref[...], preferred_element_type=jnp.float32) + be_ref[...]
    z = jnp.maximum(z, 0.0)

    # decoder1: Linear
    x1 = jnp.dot(z.astype(cdt), w1_ref[...],
                 preferred_element_type=jnp.float32) + b1_ref[...]

    # decoder2: Linear (consumes decoder1 output)
    x2 = jnp.dot(x1.astype(cdt), w2_ref[...],
                 preferred_element_type=jnp.float32) + b2_ref[...]

    x1_ref[...] = x1.astype(x1_ref.dtype)
    x2_ref[...] = x2.astype(x2_ref.dtype)


def _resident_spec(shape):
    """VMEM-resident operand: constant index_map, single-buffered."""
    try:
        return pl.BlockSpec(shape, lambda i: (0, 0), pipeline_mode=pl.Buffered(1))
    except (TypeError, AttributeError):   # older jax without pipeline_mode/Buffered
        return pl.BlockSpec(shape, lambda i: (0, 0))


def prepare_params(params, compute_dtype=jnp.bfloat16):
    """One-time cast of weights to the streaming dtype (biases stay f32).

    Call this once (outside the per-step path) so no pad/convert HLO runs per
    forward call.  Weights are laid out (in, out); biases (1, out).
    """
    return {
        "we": params["we"].astype(compute_dtype),
        "w1": params["w1"].astype(compute_dtype),
        "w2": params["w2"].astype(compute_dtype),
        "be": params["be"].astype(jnp.float32),
        "b1": params["b1"].astype(jnp.float32),
        "b2": params["b2"].astype(jnp.float32),
    }


def usad_forward(x, params, *, block_rows: int = 512, out_dtype=None,
                 vmem_limit_bytes=None):
    """Batch-tiled Pallas forward pass of the USAD net.

    Args:
      x: (B, input_dim) array (any float dtype; cast to the weight dtype
         inside the kernel to avoid an extra HBM pass).
      params: dict from prepare_params() — weights (in, out), biases (1, out).
      block_rows: target rows per grid step (auto-clamped for VMEM / megacore).
      out_dtype: dtype for x1/x2 (default: x.dtype).
    Returns:
      (x1, x2): both (B, input_dim).
    """
    B, D = x.shape
    we, be, w1, b1, w2, b2 = (params[k] for k in ("we", "be", "w1", "b1",
                                                  "w2", "b2"))
    H = we.shape[1]
    out_dtype = x.dtype if out_dtype is None else jnp.dtype(out_dtype)

    c_item = jnp.dtype(we.dtype).itemsize
    x_item = jnp.dtype(x.dtype).itemsize
    o_item = jnp.dtype(out_dtype).itemsize

    # VMEM footprint estimate (on-chip tiles pad lanes to 128, sublanes to 8).
    Dl, Hl = _round_up(D, 128), _round_up(H, 128)
    D8, H8 = _round_up(D, 8), _round_up(H, 8)
    resident_bytes = ((D8 * Hl + H8 * Dl + D8 * Dl) * c_item   # We, W1, W2 (x1 buffer)
                      + (Hl + 2 * Dl) * 4)                     # biases (f32)
    per_row = (2 * Dl * (x_item + 2 * o_item)                  # x, x1, x2 (x2 buffers)
               + (Hl + 2 * Dl) * 4)                            # f32 intermediates

    # TODO(synk): when resident_bytes exceeds the VMEM budget (large input_dim),
    # tile the decoder feature axis instead of keeping We/W1/W2 fully resident.
    avail = max(_VMEM_WORKING_BUDGET - resident_bytes, _VMEM_WORKING_BUDGET // 4)
    tm_vmem_cap = max(8, (avail // per_row) // 8 * 8)

    tm = max(8, min(_round_up(block_rows, 8), _round_up(B, 8), tm_vmem_cap))
    # Keep >=2 (aim 4) grid steps so the "parallel" batch axis feeds both v7x
    # TensorCores; v5e/v6e only see the pipelining effect.
    if B >= 64:
        tm = min(tm, _round_up(pl.cdiv(B, 4), 8))
    elif B > 8:
        tm = min(tm, _round_up(pl.cdiv(B, 2), 8))
    grid = (pl.cdiv(B, tm),)

    if vmem_limit_bytes is None:
        needed = resident_bytes + tm * per_row
        vmem_limit_bytes = min(max(int(needed * 1.5) + (2 << 20), 8 << 20), 64 << 20)

    flops = 2 * B * (D * H + H * D + D * D)
    bytes_accessed = (B * D * (x_item + 2 * o_item)
                      + (D * H + H * D + D * D) * c_item
                      + (H + 2 * D) * 4)

    row_block = pl.BlockSpec((tm, D), lambda i: (i, 0))   # streamed per batch tile

    x1, x2 = pl.pallas_call(
        _usad_kernel,
        out_shape=(jax.ShapeDtypeStruct((B, D), out_dtype),
                   jax.ShapeDtypeStruct((B, D), out_dtype)),
        grid=grid,
        in_specs=[
            row_block,                 # x   (streamed)
            _resident_spec((D, H)),    # We  (resident, single-buffered)
            _resident_spec((1, H)),    # be
            _resident_spec((H, D)),    # W1
            _resident_spec((1, D)),    # b1
            _resident_spec((D, D)),    # W2
            _resident_spec((1, D)),    # b2
        ],
        out_specs=(row_block, row_block),
        compiler_params=pltpu.CompilerParams(
            dimension_semantics=("parallel",),     # megacore sharding on v7x
            vmem_limit_bytes=int(vmem_limit_bytes)),
        cost_estimate=pl.CostEstimate(flops=flops, transcendentals=0,
                                      bytes_accessed=bytes_accessed),
    )(x, we, be, w1, b1, w2, b2)

    return x1, x2


def init_params(key, input_dim, hidden_dim):
    """Deterministic synthetic init matching nn.Linear parameter shapes.

    PyTorch stores Linear weight as (out, in); initialize in that layout then
    transpose to (in, out) for the kernel.
    """
    ks = jax.random.split(key, 6)

    def linear(kw, kb, fan_in, fan_out):
        bound = 1.0 / jnp.sqrt(fan_in)
        w = jax.random.uniform(kw, (fan_out, fan_in), jnp.float32, -bound, bound)
        b = jax.random.uniform(kb, (fan_out,), jnp.float32, -bound, bound)
        return w.T, b.reshape(1, fan_out)  # (in, out), (1, out)

    we, be = linear(ks[0], ks[1], input_dim, hidden_dim)   # encoder
    w1, b1 = linear(ks[2], ks[3], hidden_dim, input_dim)   # decoder1
    w2, b2 = linear(ks[4], ks[5], input_dim, input_dim)    # decoder2
    return {"we": we, "be": be, "w1": w1, "b1": b1, "w2": w2, "b2": b2}


def usad_reference(x, p):
    """Pure-JAX f32 reference for correctness checking."""
    z = jnp.maximum(x @ p["we"] + p["be"], 0.0)
    x1 = z @ p["w1"] + p["b1"]
    x2 = x1 @ p["w2"] + p["b2"]
    return x1, x2


if __name__ == "__main__":
    key = jax.random.PRNGKey(0)
    k_x, k_p = jax.random.split(key)

    # Small shapes; B chosen so the batch grid has several steps.
    B, INPUT_DIM, HIDDEN_DIM = 200, 16, 32
    x = jax.random.normal(k_x, (B, INPUT_DIM), jnp.float32)
    params = init_params(k_p, INPUT_DIM, HIDDEN_DIM)
    r1, r2 = usad_reference(x, params)

    # f32-streaming path: matches the reference tightly.
    p_f32 = prepare_params(params, jnp.float32)       # hoisted, one-time cast
    fwd = jax.jit(usad_forward)
    x1, x2 = fwd(x, p_f32)
    jax.block_until_ready((x1, x2))
    assert x1.shape == (B, INPUT_DIM) and x2.shape == (B, INPUT_DIM)
    assert jnp.allclose(x1, r1, atol=1e-5, rtol=1e-5)
    assert jnp.allclose(x2, r2, atol=1e-5, rtol=1e-5)

    # Default bf16-streaming path (f32 accumulation): looser tolerance.
    p_bf16 = prepare_params(params)                   # bfloat16 weights
    y1, y2 = jax.jit(usad_forward)(x, p_bf16)
    jax.block_until_ready((y1, y2))
    assert jnp.allclose(y1, r1, atol=5e-2, rtol=5e-2)
    assert jnp.allclose(y2, r2, atol=5e-2, rtol=5e-2)

    print("KERNEL_OK")
</pallas_src>

<mosaic_0001>
module attributes {stable_mosaic.version = 11 : i64} {
  func.func @_usad_kernel(%arg0: i32, %arg1: memref<56x16xf32, #tpu.memory_space<vmem>>, %arg2: memref<16x32xf32, #tpu.memory_space<vmem>>, %arg3: memref<1x32xf32, #tpu.memory_space<vmem>>, %arg4: memref<32x16xf32, #tpu.memory_space<vmem>>, %arg5: memref<1x16xf32, #tpu.memory_space<vmem>>, %arg6: memref<16x16xf32, #tpu.memory_space<vmem>>, %arg7: memref<1x16xf32, #tpu.memory_space<vmem>>, %arg8: memref<56x16xf32, #tpu.memory_space<vmem>>, %arg9: memref<56x16xf32, #tpu.memory_space<vmem>>) attributes {dimension_semantics = [#tpu.dimension_semantics<parallel>], iteration_bounds = array<i64: 4>, scalar_prefetch = 0 : i64, scratch_operands = 0 : i64, tpu.core_type = #tpu.core_type<tc>, window_params = [{transform_indices = @transform_0, window_bounds = array<i64: 56, 16>}, {pipeline_mode = #tpu.pipeline_mode<synchronous>, transform_indices = @transform_1, window_bounds = array<i64: 16, 32>}, {pipeline_mode = #tpu.pipeline_mode<synchronous>, transform_indices = @transform_2, window_bounds = array<i64: 1, 32>}, {pipeline_mode = #tpu.pipeline_mode<synchronous>, transform_indices = @transform_3, window_bounds = array<i64: 32, 16>}, {pipeline_mode = #tpu.pipeline_mode<synchronous>, transform_indices = @transform_4, window_bounds = array<i64: 1, 16>}, {pipeline_mode = #tpu.pipeline_mode<synchronous>, transform_indices = @transform_5, window_bounds = array<i64: 16, 16>}, {pipeline_mode = #tpu.pipeline_mode<synchronous>, transform_indices = @transform_6, window_bounds = array<i64: 1, 16>}, {transform_indices = @transform_7, window_bounds = array<i64: 56, 16>}, {transform_indices = @transform_8, window_bounds = array<i64: 56, 16>}]} {
    %c0 = arith.constant 0 : index
    %c0_0 = arith.constant 0 : index
    %0 = vector.load %arg1[%c0, %c0_0] : memref<56x16xf32, #tpu.memory_space<vmem>>, vector<56x16xf32>
    %c0_1 = arith.constant 0 : index
    %c0_2 = arith.constant 0 : index
    %1 = vector.load %arg2[%c0_1, %c0_2] : memref<16x32xf32, #tpu.memory_space<vmem>>, vector<16x32xf32>
    %cst = arith.constant dense<0.000000e+00> : vector<56x32xf32>
    %2 = tpu.matmul %0, %1, %cst {dimension_numbers = #tpu.dot_dimension_numbers<[1], [0], [0], [1], [0, 0, 1, 1], [], []>} : vector<56x16xf32>, vector<16x32xf32>, vector<56x32xf32> -> vector<56x32xf32>
    %c0_3 = arith.constant 0 : index
    %c0_4 = arith.constant 0 : index
    %3 = vector.load %arg3[%c0_3, %c0_4] : memref<1x32xf32, #tpu.memory_space<vmem>>, vector<1x32xf32>
    %4 = vector.broadcast %3 : vector<1x32xf32> to vector<56x32xf32>
    %5 = arith.addf %2, %4 : vector<56x32xf32>
    %cst_5 = arith.constant 0.000000e+00 : f32
    %6 = vector.broadcast %cst_5 : f32 to vector<56x32xf32>
    %7 = arith.maximumf %5, %6 : vector<56x32xf32>
    %c0_6 = arith.constant 0 : index
    %c0_7 = arith.constant 0 : index
    %8 = vector.load %arg4[%c0_6, %c0_7] : memref<32x16xf32, #tpu.memory_space<vmem>>, vector<32x16xf32>
    %cst_8 = arith.constant dense<0.000000e+00> : vector<56x16xf32>
    %9 = tpu.matmul %7, %8, %cst_8 {dimension_numbers = #tpu.dot_dimension_numbers<[1], [0], [0], [1], [0, 0, 1, 1], [], []>} : vector<56x32xf32>, vector<32x16xf32>, vector<56x16xf32> -> vector<56x16xf32>
    %c0_9 = arith.constant 0 : index
    %c0_10 = arith.constant 0 : index
    %10 = vector.load %arg5[%c0_9, %c0_10] : memref<1x16xf32, #tpu.memory_space<vmem>>, vector<1x16xf32>
    %11 = vector.broadcast %10 : vector<1x16xf32> to vector<56x16xf32>
    %12 = arith.addf %9, %11 : vector<56x16xf32>
    %c0_11 = arith.constant 0 : index
    %c0_12 = arith.constant 0 : index
    %13 = vector.load %arg6[%c0_11, %c0_12] : memref<16x16xf32, #tpu.memory_space<vmem>>, vector<16x16xf32>
    %cst_13 = arith.constant dense<0.000000e+00> : vector<56x16xf32>
    %14 = tpu.matmul %12, %13, %cst_13 {dimension_numbers = #tpu.dot_dimension_numbers<[1], [0], [0], [1], [0, 0, 1, 1], [], []>} : vector<56x16xf32>, vector<16x16xf32>, vector<56x16xf32> -> vector<56x16xf32>
    %c0_14 = arith.constant 0 : index
    %c0_15 = arith.constant 0 : index
    %15 = vector.load %arg7[%c0_14, %c0_15] : memref<1x16xf32, #tpu.memory_space<vmem>>, vector<1x16xf32>
    %16 = vector.broadcast %15 : vector<1x16xf32> to vector<56x16xf32>
    %17 = arith.addf %14, %16 : vector<56x16xf32>
    %c0_16 = arith.constant 0 : index
    %c0_17 = arith.constant 0 : index
    %18 = vector.load %arg8[%c0_16, %c0_17] : memref<56x16xf32, #tpu.memory_space<vmem>>, vector<56x16xf32>
    tpu.vector_store %arg8[%c0_16, %c0_17], %12 {strides = array<i32>} : memref<56x16xf32, #tpu.memory_space<vmem>>, vector<56x16xf32>,
    %c0_18 = arith.constant 0 : index
    %c0_19 = arith.constant 0 : index
    %19 = vector.load %arg9[%c0_18, %c0_19] : memref<56x16xf32, #tpu.memory_space<vmem>>, vector<56x16xf32>
    tpu.vector_store %arg9[%c0_18, %c0_19], %17 {strides = array<i32>} : memref<56x16xf32, #tpu.memory_space<vmem>>, vector<56x16xf32>,
    return
  }
  func.func @transform_0(%arg0: i32) -> (i32, i32) {
    %c0_i32 = arith.constant 0 : i32
    %c0_i32_0 = arith.constant 0 : i32
    return %arg0, %c0_i32 : i32, i32
  }
  func.func @transform_1(%arg0: i32) -> (i32, i32) {
    %c0_i32 = arith.constant 0 : i32
    %c0_i32_0 = arith.constant 0 : i32
    %c0_i32_1 = arith.constant 0 : i32
    return %c0_i32, %c0_i32_0 : i32, i32
  }
  func.func @transform_2(%arg0: i32) -> (i32, i32) {
    %c0_i32 = arith.constant 0 : i32
    %c0_i32_0 = arith.constant 0 : i32
    %c0_i32_1 = arith.constant 0 : i32
    return %c0_i32, %c0_i32_0 : i32, i32
  }
  func.func @transform_3(%arg0: i32) -> (i32, i32) {
    %c0_i32 = arith.constant 0 : i32
    %c0_i32_0 = arith.constant 0 : i32
    %c0_i32_1 = arith.constant 0 : i32
    return %c0_i32, %c0_i32_0 : i32, i32
  }
  func.func @transform_4(%arg0: i32) -> (i32, i32) {
    %c0_i32 = arith.constant 0 : i32
    %c0_i32_0 = arith.constant 0 : i32
    %c0_i32_1 = arith.constant 0 : i32
    return %c0_i32, %c0_i32_0 : i32, i32
  }
  func.func @transform_5(%arg0: i32) -> (i32, i32) {
    %c0_i32 = arith.constant 0 : i32
    %c0_i32_0 = arith.constant 0 : i32
    %c0_i32_1 = arith.constant 0 : i32
    return %c0_i32, %c0_i32_0 : i32, i32
  }
  func.func @transform_6(%arg0: i32) -> (i32, i32) {
    %c0_i32 = arith.constant 0 : i32
    %c0_i32_0 = arith.constant 0 : i32
    %c0_i32_1 = arith.constant 0 : i32
    return %c0_i32, %c0_i32_0 : i32, i32
  }
  func.func @transform_7(%arg0: i32) -> (i32, i32) {
    %c0_i32 = arith.constant 0 : i32
    %c0_i32_0 = arith.constant 0 : i32
    return %arg0, %c0_i32 : i32, i32
  }
  func.func @transform_8(%arg0: i32) -> (i32, i32) {
    %c0_i32 = arith.constant 0 : i32
    %c0_i32_0 = arith.constant 0 : i32
    return %arg0, %c0_i32 : i32, i32
  }
}

</mosaic_0001>

<bundles_post_ra>
// kernel: usad_forward.1
= control target key start
LH: loop header
LB: loop body
LE: loop exit
PB: predicated region body
PF: predicated region fallthrough
CT: control target
= control target key end

     0   :  { %s1690_s0 = inlined_call_operand.vmem [shape: f32[200,16], index: 0, kind: input, shape index: {}]   ;;  %s1691_s1 = inlined_call_operand.vmem [shape: f32[16,32], index: 1, kind: input, shape index: {}]   ;;  %s1692_s2 = inlined_call_operand.vmem [shape: f32[1,32], index: 2, kind: input, shape index: {}]   ;;  %s1693_s3 = inlined_call_operand.vmem [shape: f32[32,16], index: 3, kind: input, shape index: {}]   ;;  %s1694_s4 = inlined_call_operand.vmem [shape: f32[1,16], index: 4, kind: input, shape index: {}]   ;;  %s1695_s5 = inlined_call_operand.vmem [shape: f32[16,16], index: 5, kind: input, shape index: {}]   ;;  %s1696_s6 = inlined_call_operand.vmem [shape: f32[1,16], index: 6, kind: input, shape index: {}]   ;;  %s1697_s7 = inlined_call_operand.vmem [shape: f32[200,16], index: 7, kind: output, shape index: {0}]   ;;  %s1698_s8 = inlined_call_operand.vmem [shape: f32[200,16], index: 8, kind: output, shape index: {1}]  }
   0x1   :  { %1699 = sst [smem:[#allocation4_spill]] %s1690_s0 }
   0x2   :  { %s1452_s27 = smov 0   ;;  %s1454_s28 = smov 0  }
   0x3   :  { %s1456_s29 = smov 0  }
   0x4 LB: > { %s1465_s30 = sadd.s32 4294967295, %s1341_s29   ;;  %s1467_s9 = sadd.s32 1, %s1341_s29   ;;  %s1341_s29 = sphi %s1456_s29, %s1710_s29   ;;  %s1337_s28 = sphi %s1454_s28, %s1709_s28   ;;  %s1333_s27 = sphi %s1452_s27, %s1708_s27  }
   0x5   : > { %s175_s10 = ssub.s32 %s1341_s29, %s1467_s9  ;;  %s178_s11 = sadd.s32 1, %s1337_s28 }
   0x6   : > { %p176_p0 = scmp.eq.s32.totalorder %s175_s10, 0  ;;  %p188_p1 = scmp.ne.s32.totalorder %s1337_s28, %s1333_s27 }
   0x7   : > { %p189_p2 = scmp.eq.s32.totalorder %s1465_s30, 3  ;;  %p1030_p3 = scmp.ge.s32.totalorder %s1341_s29, 1 }
   0x8   : > { %s1475_s12 = scalar_select %p176_p0, %s1337_s28, %s178_s11  }
   0x9   : > { %p1477_p4 = por %p189_p2, %p188_p1  ;;  %p274_p5 = scmp.lt.s32.totalorder %s1341_s29, 5 }
   0xb   : > { %p275_p6 = pnand %p1030_p3, %p274_p5 }
   0xc   : > { %s1488_s18 = smul.u32 (!%p275_p6), 7, %s1465_s30  ;;  %s1701_s0 = sld [smem:[#allocation4_spill]] (!%p275_p6) }
   0xd   : > { %278 = sbr.rel (%p275_p6) target bundleno = 583 (0x247), region = 48 }
   0xe   : > { %p320_p7 = scmp.lt.s32.totalorder (!%p275_p6), %s1488_s18, 24 }
  0x12   : > { %v347_v0 = vld [vmem:[%s1691_s1 + $0x8] sm:$0xff]  ;;  %v346_v1 = vld [vmem:[%s1691_s1] sm:$0xff]  ;;  %s321_s19 = scalar_select %p320_p7, %s1488_s18, 24  ;;  %vm352_vm0 = vcmask 130048   ;;  %v422_v5 = vld [vmem:[%s1693_s3 + $0x18] sm:$0xff]  ;;  %vm427_vm1 = vcmask 261120  }
  0x13   : > { %388 = vmatpush.msra.mxu0 %v347_v0  ;;  %1077 = vmatpush.msra.mxu3 %v347_v0  ;;  %v421_v10 = vld [vmem:[%s1693_s3 + $0x10] sm:$0xff]  ;;  %v420_v11 = vld [vmem:[%s1693_s3 + $0x8] sm:$0xff]  ;;  %v419_v12 = vld [vmem:[%s1693_s3] sm:$0xff]  ;;  %s578_s14 = ssub.s32 (%p1477_p4), 25, %s1488_s18  ;;  %s1075_s15 = smul.u32 (%p1477_p4), 56, %s1465_s30 }
  0x14   : > { %s1031_s20 = sshll.u32 %s321_s19, 3  ;;  %461 = vmatpush.msra.mxu1 %v422_v5  ;;  %v1240_v13 = vld [vmem:[%s1692_s2] ss:$0 sm:$0xff]  ;;  %v488_v35 = vld [vmem:[%s1695_s5 + $0x8] sm:$0xff]  ;;  %p579_p8 = scmp.lt.s32.totalorder (%p1477_p4), %s578_s14, 7 }
  0x15   : > { %389 = vmatpush.msra.mxu0 %v346_v1  ;;  %1078 = vmatpush.msra.mxu3 %v346_v1  ;;  %s323_s23 = scalar_lea.vmem %s1701_s0, %s1031_s20  ;;  %v487_v36 = vld [vmem:[%s1695_s5] sm:$0xff]  ;;  %s1587_s19 = scalar_lea.vmem (%p1477_p4), %s1697_s7, %s1075_s15  }
  0x16   : > { %v339_v2 = vld [vmem:[%s323_s23] sm:$0xff]  ;;  %v340_v3 = vld [vmem:[%s323_s23 + $0x8] sm:$0xff]  ;;  %v345_v4 = vld [vmem:[%s323_s23 + $0x30] sm:$0xff]  ;;  %462 = vmatpush.msra.mxu1 %v421_v10  ;;  %528 = vmatpush.msra.mxu2 %v488_v35 }
  0x17   : > { %1032 = vmatmul.msk.f32.vlgmr.msra.gmra.mxu0 %vm352_vm0, %v339_v2  ;;  %1038 = vmatmul.msk.f32.vlgmr.msra.gmra.mxu3 %vm352_vm0, %v345_v4  ;;  %v341_v6 = vld [vmem:[%s323_s23 + $0x10] sm:$0xff]  ;;  %v342_v7 = vld [vmem:[%s323_s23 + $0x18] sm:$0xff]  ;;  %v343_v8 = vld [vmem:[%s323_s23 + $0x20] sm:$0xff] }
  0x18   : > { %1079 = vmatpush.msrb.mxu3 %v422_v5  ;;  %v344_v9 = vld [vmem:[%s323_s23 + $0x28] sm:$0xff]  ;;  %463 = vmatpush.msra.mxu1 %v420_v11  ;;  %s306_s23 = sand.u32 1, %s1333_s27   ;;  %v1241_v37 = vld [vmem:[%s1694_s4] ss:$0 sm:$0xff] }
  0x19   : > { %529 = vmatpush.msra.mxu2 %v487_v36  ;;  %s1531_s24 = smul.u32 56, %s306_s23  ;;  %v1242_v52 = vld [vmem:[%s1696_s6] ss:$0 sm:$0xff] }
  0x1a   : > { %1080 = vmatpush.msrb.mxu3 %v421_v10  ;;  %464 = vmatpush.msra.mxu1 %v419_v12 }
  0x1b   : > { %s1537_s29 = scalar_lea.vmem [#allocation2], %s1531_s24   ;;  %s1564_s11 = scalar_lea.vmem [#allocation3], %s1531_s24  }
  0x1c   : > { %1081 = vmatpush.msrb.mxu3 %v420_v11 }
  0x1e   : > { %1082 = vmatpush.msrb.mxu3 %v419_v12 }
  0x1f   : > { %1033 = vmatmul.msk.f32.gmra.mxu0 %vm352_vm0, %v340_v3 }
  0x20   : > { %1083 = vmatpush.msra.mxu3 %v488_v35 }
  0x22   : > { %1084 = vmatpush.msra.mxu3 %v487_v36 }
  0x27   : > { %1034 = vmatmul.msk.f32.gmra.mxu0 %vm352_vm0, %v341_v6 }
  0x2f   : > { %1035 = vmatmul.msk.f32.gmra.mxu0 %vm352_vm0, %v342_v7 }
  0x37   : > { %1036 = vmatmul.msk.f32.gmra.mxu0 %vm352_vm0, %v343_v8 }
  0x3f   : > { %1037 = vmatmul.msk.f32.gmra.mxu0 %vm352_vm0, %v344_v9 }
  0x94   : > { %v391_v14 = vpop.f32.mrf.mxu0 }
  0x95   : > { %v392_v15 = vadd.f32 %v1240_v13, %v391_v14 }
  0x97   : > { %v412_v16 = vmax.f32 %v392_v15, 0.0 }
  0x99   : > { %1039 = vmatmul.msk.f32.vlgmr.msra.gmra.mxu1 %vm427_vm1, %v412_v16 }
  0x9a   : > { %v409_v31 = vpop.f32.mrf.mxu3 }
  0x9b   : > { %v410_v33 = vadd.f32 %v1240_v13, %v409_v31 }
  0x9c   : > { %v394_v17 = vpop.f32.mrf.mxu0 }
  0x9d   : > { %v395_v18 = vadd.f32 %v1240_v13, %v394_v17  ;;  %v418_v34 = vmax.f32 %v410_v33, 0.0 }
  0x9f   : > { %v413_v19 = vmax.f32 %v395_v18, 0.0 }
  0xa1   : > { %1040 = vmatmul.msk.f32.gmra.mxu1 %vm427_vm1, %v413_v19 }
  0xa4   : > { %v397_v20 = vpop.f32.mrf.mxu0 }
  0xa5   : > { %v398_v21 = vadd.f32 %v1240_v13, %v397_v20 }
  0xa7   : > { %v414_v22 = vmax.f32 %v398_v21, 0.0 }
  0xa9   : > { %1041 = vmatmul.msk.f32.gmra.mxu1 %vm427_vm1, %v414_v22 }
  0xac   : > { %v400_v23 = vpop.f32.mrf.mxu0 }
  0xad   : > { %v401_v24 = vadd.f32 %v1240_v13, %v400_v23 }
  0xaf   : > { %v415_v25 = vmax.f32 %v401_v24, 0.0 }
  0xb1   : > { %1042 = vmatmul.msk.f32.gmra.mxu1 %vm427_vm1, %v415_v25 }
  0xb4   : > { %v403_v26 = vpop.f32.mrf.mxu0 }
  0xb5   : > { %v404_v27 = vadd.f32 %v1240_v13, %v403_v26 }
  0xb7   : > { %v416_v28 = vmax.f32 %v404_v27, 0.0 }
  0xb9   : > { %1043 = vmatmul.msk.f32.gmra.mxu1 %vm427_vm1, %v416_v28 }
  0xbc   : > { %v406_v29 = vpop.f32.mrf.mxu0 }
  0xbd   : > { %v407_v30 = vadd.f32 %v1240_v13, %v406_v29 }
  0xbf   : > { %v417_v32 = vmax.f32 %v407_v30, 0.0 }
  0xc1   : > { %1044 = vmatmul.msk.f32.vlgmr.msrb.gmra.mxu3 %vm427_vm1, %v417_v32 }
  0xc9   : > { %1045 = vmatmul.msk.f32.gmra.mxu3 %vm427_vm1, %v418_v34 }
 0x116   : > { %v466_v38 = vpop.f32.mrf.mxu1 }
 0x117   : > { %v467_v39 = vadd.f32 %v1241_v37, %v466_v38 }
 0x119   : > { %552 = vst.msk [vmem:[%s1537_s29] sm:$0xff] %vm352_vm0, %v467_v39  ;;  %1046 = vmatmul.msk.f32.vlgmr.msra.gmra.mxu2 %vm352_vm0, %v467_v39 }
 0x11e   : > { %v469_v40 = vpop.f32.mrf.mxu1 }
 0x11f   : > { %v470_v41 = vadd.f32 %v1241_v37, %v469_v40 }
 0x121   : > { %553 = vst.msk [vmem:[%s1537_s29 + $0x8] sm:$0xff] %vm352_vm0, %v470_v41  ;;  %1047 = vmatmul.msk.f32.gmra.mxu2 %vm352_vm0, %v470_v41 }
 0x126   : > { %v472_v42 = vpop.f32.mrf.mxu1 }
 0x127   : > { %v473_v43 = vadd.f32 %v1241_v37, %v472_v42 }
 0x129   : > { %554 = vst.msk [vmem:[%s1537_s29 + $0x10] sm:$0xff] %vm352_vm0, %v473_v43  ;;  %1048 = vmatmul.msk.f32.gmra.mxu2 %vm352_vm0, %v473_v43 }
 0x12e   : > { %v475_v44 = vpop.f32.mrf.mxu1 }
 0x12f   : > { %v476_v45 = vadd.f32 %v1241_v37, %v475_v44 }
 0x131   : > { %555 = vst.msk [vmem:[%s1537_s29 + $0x18] sm:$0xff] %vm352_vm0, %v476_v45  ;;  %1049 = vmatmul.msk.f32.gmra.mxu2 %vm352_vm0, %v476_v45 }
 0x136   : > { %v478_v46 = vpop.f32.mrf.mxu1 }
 0x137   : > { %v479_v47 = vadd.f32 %v1241_v37, %v478_v46 }
 0x139   : > { %556 = vst.msk [vmem:[%s1537_s29 + $0x20] sm:$0xff] %vm352_vm0, %v479_v47  ;;  %1050 = vmatmul.msk.f32.gmra.mxu2 %vm352_vm0, %v479_v47 }
 0x144   : > { %v481_v48 = vpop.f32.mrf.mxu3 }
 0x145   : > { %v482_v49 = vadd.f32 %v1241_v37, %v481_v48 }
 0x147   : > { %557 = vst.msk [vmem:[%s1537_s29 + $0x28] sm:$0xff] %vm352_vm0, %v482_v49  ;;  %1051 = vmatmul.msk.f32.gmra.mxu2 %vm352_vm0, %v482_v49 }
 0x14c   : > { %v484_v50 = vpop.f32.mrf.mxu3 }
 0x14d   : > { %v485_v51 = vadd.f32 %v1241_v37, %v484_v50 }
 0x14f   : > { %558 = vst.msk [vmem:[%s1537_s29 + $0x30] sm:$0xff] %vm352_vm0, %v485_v51  ;;  %1052 = vmatmul.msk.f32.vlgmr.msra.gmra.mxu3 %vm352_vm0, %v485_v51 }
 0x19c   : > { %v531_v53 = vpop.f32.mrf.mxu2 }
 0x19d   : > { %v532_v54 = vadd.f32 %v1242_v52, %v531_v53 }
 0x19f   : > { %559 = vst.msk [vmem:[%s1564_s11] sm:$0xff] %vm352_vm0, %v532_v54 }
 0x1a4   : > { %v534_v55 = vpop.f32.mrf.mxu2 }
 0x1a5   : > { %v535_v56 = vadd.f32 %v1242_v52, %v534_v55 }
 0x1a7   : > { %560 = vst.msk [vmem:[%s1564_s11 + $0x8] sm:$0xff] %vm352_vm0, %v535_v56 }
 0x1ac   : > { %v537_v57 = vpop.f32.mrf.mxu2 }
 0x1ad   : > { %v538_v58 = vadd.f32 %v1242_v52, %v537_v57 }
 0x1af   : > { %561 = vst.msk [vmem:[%s1564_s11 + $0x10] sm:$0xff] %vm352_vm0, %v538_v58 }
 0x1b4   : > { %v540_v59 = vpop.f32.mrf.mxu2 }
 0x1b5   : > { %v541_v60 = vadd.f32 %v1242_v52, %v540_v59 }
 0x1b7   : > { %562 = vst.msk [vmem:[%s1564_s11 + $0x18] sm:$0xff] %vm352_vm0, %v541_v60 }
 0x1bc   : > { %v543_v61 = vpop.f32.mrf.mxu2 }
 0x1bd   : > { %v544_v62 = vadd.f32 %v1242_v52, %v543_v61 }
 0x1bf   : > { %563 = vst.msk [vmem:[%s1564_s11 + $0x20] sm:$0xff] %vm352_vm0, %v544_v62 }
 0x1ca   : > { %v546_v63 = vpop.f32.mrf.mxu2 }
 0x1cb   : > { %v547_v0 = vadd.f32 %v1242_v52, %v546_v63 }
 0x1cd   : > { %564 = vst.msk [vmem:[%s1564_s11 + $0x28] sm:$0xff] %vm352_vm0, %v547_v0 }
 0x1d1   : > { %576 = sbr.rel (!%p1477_p4) target bundleno = 524 (0x20c), region = 52 }
 0x1d2   : > { %v549_v1 = vpop.f32.mrf.mxu3 }
 0x1d3   : > { %v550_v2 = vadd.f32 %v1242_v52, %v549_v1 }
 0x1d5   : > { %565 = vst.msk [vmem:[%s1564_s11 + $0x30] sm:$0xff] %vm352_vm0, %v550_v2 }
 0x1d6   : > { %s1712_s14 = smov (!%p579_p8, %s578_s14), 7 }
 0x1d7   : > { %s1053_s20 = sshll.u32 %s1712_s14, 3 }
 0x1d8   : > { %p1056_p9 = scmp.eq.s32.totalorder %s1053_s20, 0 }
 0x1d9   : > { %1243 = sdivrem.u32 (!%p1056_p9), %s1712_s14, 7 }
 0x1da   : > { %587 = sbr.rel (%p1056_p9) target bundleno = 524 (0x20c), region = 56 }
 0x1e2   : > { %s1593_s21 = spop.drf %1243 }
 0x1e3   : > { %s1245_s22 = spop.drf %1243  ;;  %p1057_p10 = scmp.le.s32.totalorder %s1593_s21, 0 }
 0x1e4   : > { %s1702_s23 = smov (!%p1057_p10), %s1587_s19  ;;  %s1703_s24 = smov (!%p1057_p10), %s1537_s29 }
 0x1e5   : > { %946 = sbr.rel (%p1057_p10) target bundleno = 498 (0x1f2), region = 204  ;;  %s1602_s25 = smov (!%p1057_p10), 0  }
 0x1e6   : > { %s1604_s26 = smov (!%p1057_p10), 0  }
 0x1ea LB: >> { %v664_v3 = vld [vmem:[%s1349_s24] sm:$0xff]  ;;  %v666_v4 = vld [vmem:[%s1349_s24 + $0x8] sm:$0xff]  ;;  %v668_v5 = vld [vmem:[%s1349_s24 + $0x10] sm:$0xff]  ;;  %s678_s27 = sadd.s32 1, %s1353_s25  ;;  %s658_s26 = sadd.s32 1, %s1357_s26   ;;  %s1357_s26 = sphi %s1604_s26, %s658_s26   ;;  %s1353_s25 = sphi %s1602_s25, %s1704_s25   ;;  %s1349_s24 = sphi %s1703_s24, %s683_s24   ;;  %s1345_s23 = sphi %s1702_s23, %s684_s23  }
 0x1eb   : >> { %665 = vst [vmem:[%s1345_s23] sm:$0xff] %v664_v3  ;;  %v670_v6 = vld [vmem:[%s1349_s24 + $0x18] sm:$0xff]  ;;  %p679_p11 = scmp.ge.s32.totalorder %s678_s27, %s1593_s21  ;;  %v672_v7 = vld [vmem:[%s1349_s24 + $0x20] sm:$0xff]  ;;  %v674_v8 = vld [vmem:[%s1349_s24 + $0x28] sm:$0xff]  ;;  %p657_p12 = scmp.ge.s32.totalorder %s658_s26, %s1593_s21 }
 0x1ec   : >> { %667 = vst [vmem:[%s1345_s23 + $0x8] sm:$0xff] %v666_v4  ;;  %v676_v9 = vld [vmem:[%s1349_s24 + $0x30] sm:$0xff] }
 0x1ed   : >> { %669 = vst [vmem:[%s1345_s23 + $0x10] sm:$0xff] %v668_v5  ;;  %s1714_s27 = smov (%p679_p11, %s678_s27), 0  ;;  %660 = sbr.rel (!%p657_p12) target bundleno = 490 (0x1ea), region = 210 }
 0x1ee   : >> { %671 = vst [vmem:[%s1345_s23 + $0x18] sm:$0xff] %v670_v6  ;;  %s681_s10 = smul.u32 56, %s1714_s27  ;;  %s1704_s25 = smov %s1714_s27 }
 0x1ef   : >> { %673 = vst [vmem:[%s1345_s23 + $0x20] sm:$0xff] %v672_v7 }
 0x1f0   : >> { %675 = vst [vmem:[%s1345_s23 + $0x28] sm:$0xff] %v674_v8  ;;  %s683_s24 = scalar_lea.vmem %s1537_s29, %s681_s10 [#allocation2]  }
 0x1f1   : >> { %677 = vst [vmem:[%s1345_s23 + $0x30] sm:$0xff] %v676_v9  ;;  %s684_s23 = scalar_lea.vmem %s1587_s19, %s681_s10  }
 0x1f2 PF: > { %1246 = sdivrem.u32 %s1712_s14, 7 }
 0x1f3   : > { %s1058_s15 = smul.u32 56, %s1593_s21 }
 0x1f5   : > { %s1625_s16 = scalar_lea.vmem %s1537_s29, %s1058_s15 [#allocation2]   ;;  %s691_s17 = scalar_lea.vmem %s1587_s19, %s1058_s15  }
 0x1fb   : > { %s1247_s20 = spop.drf %1246 }
 0x1fc   : > { %s1248_s22 = spop.drf %1246 }
 0x1fd   : > { %p1060_p13 = scmp.le.s32.totalorder %s1248_s22, 0 }
 0x1fe   : > { %s1359_s10 = smov (!%p1060_p13), %s691_s17   ;;  %s1363_s27 = smov (!%p1060_p13), %s1625_s16  }
 0x1ff   : > { %960 = sbr.rel (%p1060_p13) target bundleno = 524 (0x20c), region = 215  ;;  %s1367_s0 = smov (!%p1060_p13), 0  }
 0x200   : > { %s1371_s26 = smov (!%p1060_p13), 0  }
 0x204 LB: >> { %v701_v10 = vld [vmem:[%s1365_s27] sm:$0xff]  ;;  %s703_s29 = sadd.s32 1, %s1369_s0  ;;  %s695_s26 = sadd.s32 1, %s1373_s26   ;;  %s1373_s26 = sphi %s1371_s26, %s695_s26   ;;  %s1369_s0 = sphi %s1367_s0, %s1368_s0   ;;  %s1365_s27 = sphi %s1363_s27, %s708_s27   ;;  %s1361_s10 = sphi %s1359_s10, %s709_s10  }
 0x205   : >> { %702 = vst [vmem:[%s1361_s10] sm:$0xff] %v701_v10  ;;  %p704_p0 = scmp.ge.s32.totalorder %s703_s29, %s1248_s22  ;;  %p694_p1 = scmp.ge.s32.totalorder %s695_s26, %s1248_s22 }
 0x207   : >> { %s1716_s29 = smov (%p704_p0, %s703_s29), 0  ;;  %697 = sbr.rel (!%p694_p1) target bundleno = 516 (0x204), region = 221 }
 0x208   : >> { %s1061_s14 = sshll.u32 %s1716_s29, 3  ;;  %s1368_s0 = smov %s1716_s29  }
 0x209   : >> { %s708_s27 = scalar_lea.vmem %s1625_s16, %s1061_s14 [#allocation2]   ;;  %s709_s10 = scalar_lea.vmem %s691_s17, %s1061_s14  }
 0x20c PF: > { %715 = sbr.rel (!%p1477_p4) target bundleno = 583 (0x247), region = 104  ;;  %s717_s0 = ssub.s32 (%p1477_p4), 25, %s1488_s18 }
 0x20d   : > { %s1076_s19 = smul.u32 (%p1477_p4), 56, %s1465_s30  ;;  %p718_p2 = scmp.lt.s32.totalorder (%p1477_p4), %s717_s0, 7 }
 0x20f   : > { %s1637_s24 = scalar_lea.vmem (%p1477_p4), %s1698_s8, %s1076_s19  }
 0x211   : > { %s1718_s0 = smov (!%p718_p2, %s717_s0), 7 }
 0x212   : > { %s1063_s25 = sshll.u32 %s1718_s0, 3 }
 0x213   : > { %p1066_p3 = scmp.eq.s32.totalorder %s1063_s25, 0 }
 0x214   : > { %1249 = sdivrem.u32 (!%p1066_p3), %s1718_s0, 7 }
 0x215   : > { %726 = sbr.rel (%p1066_p3) target bundleno = 583 (0x247), region = 108 }
 0x21d   : > { %s1643_s13 = spop.drf %1249 }
 0x21e   : > { %s1251_s15 = spop.drf %1249  ;;  %p1067_p4 = scmp.le.s32.totalorder %s1643_s13, 0 }
 0x21f   : > { %s1705_s30 = smov (!%p1067_p4), %s1637_s24  ;;  %s1706_s18 = smov (!%p1067_p4), %s1564_s11 }
 0x220   : > { %974 = sbr.rel (%p1067_p4) target bundleno = 557 (0x22d), region = 226  ;;  %s1652_s16 = smov (!%p1067_p4), 0  }
 0x221   : > { %s1654_s17 = smov (!%p1067_p4), 0  }
 0x225 LB: >> { %v803_v11 = vld [vmem:[%s1381_s18] sm:$0xff]  ;;  %v805_v12 = vld [vmem:[%s1381_s18 + $0x8] sm:$0xff]  ;;  %v807_v13 = vld [vmem:[%s1381_s18 + $0x10] sm:$0xff]  ;;  %s817_s20 = sadd.s32 1, %s1385_s16  ;;  %s797_s17 = sadd.s32 1, %s1389_s17   ;;  %s1389_s17 = sphi %s1654_s17, %s797_s17   ;;  %s1385_s16 = sphi %s1652_s16, %s1707_s16   ;;  %s1381_s18 = sphi %s1706_s18, %s822_s18   ;;  %s1377_s30 = sphi %s1705_s30, %s823_s30  }
 0x226   : >> { %804 = vst [vmem:[%s1377_s30] sm:$0xff] %v803_v11  ;;  %v809_v14 = vld [vmem:[%s1381_s18 + $0x18] sm:$0xff]  ;;  %p818_p5 = scmp.ge.s32.totalorder %s817_s20, %s1643_s13  ;;  %v811_v15 = vld [vmem:[%s1381_s18 + $0x20] sm:$0xff]  ;;  %v813_v16 = vld [vmem:[%s1381_s18 + $0x28] sm:$0xff]  ;;  %p796_p6 = scmp.ge.s32.totalorder %s797_s17, %s1643_s13 }
 0x227   : >> { %806 = vst [vmem:[%s1377_s30 + $0x8] sm:$0xff] %v805_v12  ;;  %v815_v17 = vld [vmem:[%s1381_s18 + $0x30] sm:$0xff] }
 0x228   : >> { %808 = vst [vmem:[%s1377_s30 + $0x10] sm:$0xff] %v807_v13  ;;  %s1720_s20 = smov (%p818_p5, %s817_s20), 0  ;;  %799 = sbr.rel (!%p796_p6) target bundleno = 549 (0x225), region = 232 }
 0x229   : >> { %810 = vst [vmem:[%s1377_s30 + $0x18] sm:$0xff] %v809_v14  ;;  %s820_s22 = smul.u32 56, %s1720_s20  ;;  %s1707_s16 = smov %s1720_s20 }
 0x22a   : >> { %812 = vst [vmem:[%s1377_s30 + $0x20] sm:$0xff] %v811_v15 }
 0x22b   : >> { %814 = vst [vmem:[%s1377_s30 + $0x28] sm:$0xff] %v813_v16  ;;  %s822_s18 = scalar_lea.vmem %s1564_s11, %s820_s22 [#allocation3]  }
 0x22c   : >> { %816 = vst [vmem:[%s1377_s30 + $0x30] sm:$0xff] %v815_v17  ;;  %s823_s30 = scalar_lea.vmem %s1637_s24, %s820_s22  }
 0x22d PF: > { %1252 = sdivrem.u32 %s1718_s0, 7 }
 0x22e   : > { %s1068_s10 = smul.u32 56, %s1643_s13 }
 0x230   : > { %s1675_s27 = scalar_lea.vmem %s1564_s11, %s1068_s10 [#allocation3]   ;;  %s830_s26 = scalar_lea.vmem %s1637_s24, %s1068_s10  }
 0x236   : > { %s1253_s29 = spop.drf %1252 }
 0x237   : > { %s1254_s14 = spop.drf %1252 }
 0x238   : > { %p1070_p7 = scmp.le.s32.totalorder %s1254_s14, 0 }
 0x239   : > { %s1391_s19 = smov (!%p1070_p7), %s830_s26   ;;  %s1395_s21 = smov (!%p1070_p7), %s1675_s27  }
 0x23a   : > { %988 = sbr.rel (%p1070_p7) target bundleno = 583 (0x247), region = 237  ;;  %s1399_s23 = smov (!%p1070_p7), 0  }
 0x23b   : > { %s1403_s25 = smov (!%p1070_p7), 0  }
 0x23f LB: >> { %v840_v18 = vld [vmem:[%s1397_s21] sm:$0xff]  ;;  %s842_s11 = sadd.s32 1, %s1401_s23  ;;  %s834_s25 = sadd.s32 1, %s1405_s25   ;;  %s1405_s25 = sphi %s1403_s25, %s834_s25   ;;  %s1401_s23 = sphi %s1399_s23, %s1400_s23   ;;  %s1397_s21 = sphi %s1395_s21, %s847_s21   ;;  %s1393_s19 = sphi %s1391_s19, %s848_s19  }
 0x240   : >> { %841 = vst [vmem:[%s1393_s19] sm:$0xff] %v840_v18  ;;  %p843_p8 = scmp.ge.s32.totalorder %s842_s11, %s1254_s14  ;;  %p833_p9 = scmp.ge.s32.totalorder %s834_s25, %s1254_s14 }
 0x242   : >> { %s1722_s11 = smov (%p843_p8, %s842_s11), 0  ;;  %836 = sbr.rel (!%p833_p9) target bundleno = 575 (0x23f), region = 243 }
 0x243   : >> { %s1071_s0 = sshll.u32 %s1722_s11, 3  ;;  %s1400_s23 = smov %s1722_s11  }
 0x244   : >> { %s847_s21 = scalar_lea.vmem %s1675_s27, %s1071_s0 [#allocation3]   ;;  %s848_s19 = scalar_lea.vmem %s830_s26, %s1071_s0  }
 0x247 PF: > { %p16_p10 = scmp.ge.s32.totalorder %s1467_s9, 6   ;;  %s1708_s27 = smov %s1337_s28 }
 0x248   : > { %s1709_s28 = smov %s1475_s12  ;;  %s1710_s29 = smov %s1467_s9 }
 0x249   :  { %18 = sbr.rel (!%p16_p10) target bundleno = 4 (0x4), region = 254 }

</bundles_post_ra>
